<compile_context>
chip_gen: v7x
topology: tpu7x:2x2x1
jax: 0.10.0
libtpu: 0.0.40
codegen_flags: <defaults>
</compile_context>

<pallas_src>
import functools

import jax
import jax.numpy as jnp
from jax.experimental import pallas as pl
from jax.experimental.pallas import tpu as pltpu

KS = 3          # kernel_size
EPS = 1e-3      # BatchNorm eps


# ----------------------------------------------------------------------------
# Pass 1: fused conv (all three branches) + per-tile BN statistics.
# ----------------------------------------------------------------------------
def _conv_stats_kernel(ht_ref, x_ref, hb_ref, w_ref, y_ref, stats_ref):
    """One row-tile of all three convs as 3 banded matmuls + stats accumulation.

    ht_ref    : (1, 1, 1, W*Cin)       halo row above the tile (zeros at border)
    x_ref     : (1, TH, W*Cin)         tile rows (lane-flattened W,Cin)
    hb_ref    : (1, 1, 1, W*Cin)       halo row below the tile
    w_ref     : (3, W*Cin, Np)         band weights per kh (square|ver|hor fused)
    y_ref     : (1, TH, Np)            conv slab: columns = branch-major (b, w, cout)
    stats_ref : (1, 2, Np)             per-batch running [col_sum; col_sumsq]
    """
    th = x_ref.shape[1]
    n_cols = y_ref.shape[2]

    # (TH+2, W*Cin) tile with 1-row halo on each side.
    xt = jnp.concatenate([ht_ref[0, 0], x_ref[0], hb_ref[0, 0]], axis=0)

    acc = jnp.zeros((th, n_cols), jnp.float32)
    for kh in range(KS):                      # static unroll, 3 wide-K MXU calls
        acc = acc + jnp.dot(xt[kh:kh + th, :], w_ref[kh],
                            preferred_element_type=jnp.float32)
    y_ref[0] = acc

    # Partial BN statistics: per-column sum and sum of squares (sublane reduce).
    part = jnp.concatenate(
        [jnp.sum(acc, axis=0, keepdims=True),
         jnp.sum(acc * acc, axis=0, keepdims=True)], axis=0)      # (2, Np)

    @pl.when(pl.program_id(1) == 0)
    def _():
        stats_ref[...] = jnp.zeros_like(stats_ref)

    stats_ref[0] = stats_ref[0] + part


# ----------------------------------------------------------------------------
# Pass 2: fused BN (precomputed scale/shift) + branch sum, lane-dense store.
# ----------------------------------------------------------------------------
def _bn_sum_kernel(y_ref, scale_ref, shift_ref, o_ref):
    """out = sum_b (y_b * scale_b) + sum_b shift_b for one row tile.

    y_ref     : (1, TH, Np)   conv slab from pass 1 (branch-major columns)
    scale_ref : (1, Np)       per-column gamma * rsqrt(var + eps)
    shift_ref : (1, W*Cout)   per-output-column sum_b (beta_b - mean_b*scale_b)
    o_ref     : (1, TH, W*Cout)
    """
    wc = o_ref.shape[2]
    z = y_ref[0] * scale_ref[...]                                  # (TH, Np)
    o_ref[0] = (z[:, 0:wc] + z[:, wc:2 * wc] + z[:, 2 * wc:3 * wc]
                + shift_ref[...])


# ----------------------------------------------------------------------------
# Wrapper-side weight fusion: band (Toeplitz) matrix combining all 3 branches.
# ----------------------------------------------------------------------------
def _build_band_weights(w_sq, w_ver, w_hor, W, n_cols):
    """Return (3, W*Cin, n_cols) band weights.

    Row index      = w_in * Cin + ci           (input column, channel)
    Column index   = b * W*Cout + w * Cout + co (branch-major output layout)
    W-direction zero padding of the convs is realized by simply omitting
    out-of-range taps (they have no band entry).
    """
    _, _, Cin, Cout = w_sq.shape
    wc = W * Cout
    w_all = jnp.arange(W)
    bands = []
    for kh in range(KS):
        m = jnp.zeros((W, Cin, 3, W, Cout), jnp.float32)
        for kw in range(KS):
            off = kw - 1
            lo, hi = max(0, -off), min(W, W - off)
            w_out = jnp.arange(lo, hi)
            w_in = w_out + off
            m = m.at[w_in, :, 0, w_out, :].add(w_sq[kh, kw])        # square 3x3
            if kh == 1:
                m = m.at[w_in, :, 2, w_out, :].add(w_hor[kw])       # horizontal 1x3
        m = m.at[w_all, :, 1, w_all, :].add(w_ver[kh])              # vertical 3x1
        band = m.reshape(W * Cin, 3 * wc)
        if n_cols > 3 * wc:
            band = jnp.pad(band, ((0, 0), (0, n_cols - 3 * wc)))
        bands.append(band)
    return jnp.stack(bands, axis=0)


# ----------------------------------------------------------------------------
# Forward wrapper: NCHW in / NCHW out.
# ----------------------------------------------------------------------------
def acblock_forward(x_nchw, w_sq, w_ver, w_hor, gamma, beta, *, tile_h=None):
    N, Cin, H, W = x_nchw.shape
    Cout = w_sq.shape[-1]
    w_cin = W * Cin
    wc = W * Cout
    n_cols = ((3 * wc + 127) // 128) * 128          # lane-dense conv-slab width

    if tile_h is None:
        tile_h = H
        for cand in (512, 256, 128, 64, 32, 16, 8):
            if cand <= H and H % cand == 0:
                tile_h = cand
                break
    assert H % tile_h == 0, (H, tile_h)
    assert tile_h == H or tile_h % 8 == 0, tile_h
    n_t = H // tile_h

    # NCHW -> (N, H, W*Cin): single layout pass, no full-tensor spatial pad.
    x = jnp.transpose(x_nchw, (0, 2, 3, 1)).astype(jnp.float32).reshape(N, H, w_cin)

    # Tiny per-tile halo rows (zero rows at image top/bottom borders).
    zrow = jnp.zeros((N, 1, 1, w_cin), jnp.float32)
    tops = [zrow] + [x[:, t * tile_h - 1:t * tile_h][:, None]
                     for t in range(1, n_t)]
    bots = [x[:, (t + 1) * tile_h:(t + 1) * tile_h + 1][:, None]
            for t in range(n_t - 1)] + [zrow]
    halo_top = jnp.concatenate(tops, axis=1)        # (N, n_t, 1, W*Cin)
    halo_bot = jnp.concatenate(bots, axis=1)        # (N, n_t, 1, W*Cin)

    # Fused band weights for all three branches (built once, VMEM-resident).
    w_band = _build_band_weights(w_sq, w_ver, w_hor, W, n_cols)   # (3, W*Cin, Np)

    vmem_limit = 48 * 1024 * 1024       # headroom; still below v7x 64 MiB physical

    conv_out, stats = pl.pallas_call(
        _conv_stats_kernel,
        grid=(N, n_t),
        in_specs=[
            pl.BlockSpec((1, 1, 1, w_cin), lambda n, t: (n, t, 0, 0)),   # halo top
            pl.BlockSpec((1, tile_h, w_cin), lambda n, t: (n, t, 0)),    # tile rows
            pl.BlockSpec((1, 1, 1, w_cin), lambda n, t: (n, t, 0, 0)),   # halo bot
            pl.BlockSpec((KS, w_cin, n_cols), lambda n, t: (0, 0, 0)),   # band W (resident)
        ],
        out_specs=(
            pl.BlockSpec((1, tile_h, n_cols), lambda n, t: (n, t, 0)),   # conv slab
            pl.BlockSpec((1, 2, n_cols), lambda n, t: (n, 0, 0)),        # stats acc
        ),
        out_shape=(
            jax.ShapeDtypeStruct((N, H, n_cols), jnp.float32),
            jax.ShapeDtypeStruct((N, 2, n_cols), jnp.float32),
        ),
        compiler_params=pltpu.CompilerParams(
            dimension_semantics=("parallel", "arbitrary"),
            vmem_limit_bytes=vmem_limit),
    )(halo_top, x, halo_bot, w_band)

    # Global BN statistics -> per-branch scale/shift (tiny, plain XLA ops).
    m_tot = N * H * W
    s = jnp.sum(stats, axis=0)[:, :3 * wc].reshape(2, 3, W, Cout).sum(axis=2)
    mean = s[0] / m_tot
    var = s[1] / m_tot - mean * mean                # E[x^2] - mean^2 (f32)
    scale = gamma * jax.lax.rsqrt(var + EPS)        # (3, Cout)
    shift = beta - mean * scale                     # (3, Cout)
    scale_cols = jnp.broadcast_to(scale[:, None, :], (3, W, Cout)).reshape(1, 3 * wc)
    if n_cols > 3 * wc:
        scale_cols = jnp.pad(scale_cols, ((0, 0), (0, n_cols - 3 * wc)))
    shift_row = jnp.broadcast_to(jnp.sum(shift, axis=0)[None, :],
                                 (W, Cout)).reshape(1, wc)

    out = pl.pallas_call(
        _bn_sum_kernel,
        grid=(N, n_t),
        in_specs=[
            pl.BlockSpec((1, tile_h, n_cols), lambda n, t: (n, t, 0)),
            pl.BlockSpec((1, n_cols), lambda n, t: (0, 0)),
            pl.BlockSpec((1, wc), lambda n, t: (0, 0)),
        ],
        out_specs=pl.BlockSpec((1, tile_h, wc), lambda n, t: (n, t, 0)),
        out_shape=jax.ShapeDtypeStruct((N, H, wc), jnp.float32),
        compiler_params=pltpu.CompilerParams(
            dimension_semantics=("parallel", "parallel"),
            vmem_limit_bytes=vmem_limit),
    )(conv_out, scale_cols, shift_row)

    return jnp.transpose(out.reshape(N, H, W, Cout), (0, 3, 1, 2))   # -> NCHW


# ----------------------------------------------------------------------------
# Pure-JAX reference (lax conv + batch-stat BN) for verification.
# ----------------------------------------------------------------------------
def acblock_reference(x_nchw, w_sq, w_ver, w_hor, gamma, beta):
    x = jnp.transpose(x_nchw, (0, 2, 3, 1)).astype(jnp.float32)
    Cin, Cout = w_sq.shape[2], w_sq.shape[3]
    dn = ('NHWC', 'HWIO', 'NHWC')

    def conv(inp, w, pad):
        return jax.lax.conv_general_dilated(
            inp, w, window_strides=(1, 1), padding=pad, dimension_numbers=dn)

    sq = conv(x, w_sq, [(1, 1), (1, 1)])
    ver = conv(x, w_ver.reshape(KS, 1, Cin, Cout), [(1, 1), (0, 0)])
    hor = conv(x, w_hor.reshape(1, KS, Cin, Cout), [(0, 0), (1, 1)])

    def bn(y, i):
        mean = jnp.mean(y, axis=(0, 1, 2))
        var = jnp.mean(jnp.square(y - mean), axis=(0, 1, 2))
        return (y - mean) * jax.lax.rsqrt(var + EPS) * gamma[i] + beta[i]

    out = bn(sq, 0) + bn(ver, 1) + bn(hor, 2)
    return jnp.transpose(out, (0, 3, 1, 2))


if __name__ == "__main__":
    # Small shapes consistent with the module: N=2, Cin=4, H=W=16, Cout=8.
    N, Cin, H, W, Cout = 2, 4, 16, 16, 8

    key = jax.random.PRNGKey(0)
    kx, ks, kv, kh, kg, kb = jax.random.split(key, 6)

    x = jax.random.normal(kx, (N, Cin, H, W), dtype=jnp.float32)          # NCHW
    # Conv weights stored in HWIO (PyTorch OIHW transposed); synthetic init.
    w_sq = jax.random.normal(ks, (KS, KS, Cin, Cout), dtype=jnp.float32) * 0.1
    w_ver = jax.random.normal(kv, (KS, Cin, Cout), dtype=jnp.float32) * 0.1
    w_hor = jax.random.normal(kh, (KS, Cin, Cout), dtype=jnp.float32) * 0.1
    # BN affine params for [square_bn, ver_bn, hor_bn].
    gamma = 1.0 + 0.1 * jax.random.normal(kg, (3, Cout), dtype=jnp.float32)
    beta = 0.1 * jax.random.normal(kb, (3, Cout), dtype=jnp.float32)

    # tile_h=8 -> 2 row tiles per batch image: exercises the halo handling and
    # the cross-tile BN-statistics reduction.
    fwd = jax.jit(functools.partial(acblock_forward, tile_h=8))

    out = jax.block_until_ready(fwd(x, w_sq, w_ver, w_hor, gamma, beta))
    ref = jax.block_until_ready(
        acblock_reference(x, w_sq, w_ver, w_hor, gamma, beta))

    assert out.shape == (N, Cout, H, W), out.shape
    max_err = float(jnp.max(jnp.abs(out - ref)))
    assert jnp.allclose(out, ref, rtol=1e-3, atol=1e-3), max_err

    print("KERNEL_OK")
</pallas_src>

<mosaic_0001>
module attributes {stable_mosaic.version = 11 : i64} {
  func.func @_conv_stats_kernel(%arg0: i32, %arg1: i32, %arg2: memref<1x1x1x64xf32, #tpu.memory_space<vmem>>, %arg3: memref<1x8x64xf32, #tpu.memory_space<vmem>>, %arg4: memref<1x1x1x64xf32, #tpu.memory_space<vmem>>, %arg5: memref<3x64x384xf32, #tpu.memory_space<vmem>>, %arg6: memref<1x8x384xf32, #tpu.memory_space<vmem>>, %arg7: memref<1x2x384xf32, #tpu.memory_space<vmem>>) attributes {dimension_semantics = [#tpu.dimension_semantics<parallel>, #tpu.dimension_semantics<arbitrary>], iteration_bounds = array<i64: 2, 2>, scalar_prefetch = 0 : i64, scratch_operands = 0 : i64, tpu.core_type = #tpu.core_type<tc>, window_params = [{transform_indices = @transform_0, window_bounds = array<i64: 1, 1, 1, 64>}, {transform_indices = @transform_1, window_bounds = array<i64: 1, 8, 64>}, {transform_indices = @transform_2, window_bounds = array<i64: 1, 1, 1, 64>}, {pipeline_mode = #tpu.pipeline_mode<synchronous>, transform_indices = @transform_3, window_bounds = array<i64: 3, 64, 384>}, {transform_indices = @transform_4, window_bounds = array<i64: 1, 8, 384>}, {transform_indices = @transform_5, window_bounds = array<i64: 1, 2, 384>}]} {
    %c0 = arith.constant 0 : index
    %c0_0 = arith.constant 0 : index
    %c0_1 = arith.constant 0 : index
    %c0_2 = arith.constant 0 : index
    %0 = vector.load %arg2[%c0, %c0_0, %c0_1, %c0_2] : memref<1x1x1x64xf32, #tpu.memory_space<vmem>>, vector<1x1x1x64xf32>
    %1 = vector.shape_cast %0 : vector<1x1x1x64xf32> to vector<1x64xf32>
    %c0_3 = arith.constant 0 : index
    %c0_4 = arith.constant 0 : index
    %c0_5 = arith.constant 0 : index
    %2 = vector.load %arg3[%c0_3, %c0_4, %c0_5] : memref<1x8x64xf32, #tpu.memory_space<vmem>>, vector<1x8x64xf32>
    %3 = vector.shape_cast %2 : vector<1x8x64xf32> to vector<8x64xf32>
    %c0_6 = arith.constant 0 : index
    %c0_7 = arith.constant 0 : index
    %c0_8 = arith.constant 0 : index
    %c0_9 = arith.constant 0 : index
    %4 = vector.load %arg4[%c0_6, %c0_7, %c0_8, %c0_9] : memref<1x1x1x64xf32, #tpu.memory_space<vmem>>, vector<1x1x1x64xf32>
    %5 = vector.shape_cast %4 : vector<1x1x1x64xf32> to vector<1x64xf32>
    %6 = tpu.concatenate %1, %3, %5 in 0 : vector<1x64xf32>, vector<8x64xf32>, vector<1x64xf32> -> vector<10x64xf32>
    %cst = arith.constant 0.000000e+00 : f32
    %7 = vector.broadcast %cst : f32 to vector<8x384xf32>
    %8 = vector.extract_strided_slice %6 {offsets = [0, 0], sizes = [8, 64], strides = [1, 1]} : vector<10x64xf32> to vector<8x64xf32>
    %c0_10 = arith.constant 0 : index
    %c0_11 = arith.constant 0 : index
    %c0_12 = arith.constant 0 : index
    %9 = vector.load %arg5[%c0_10, %c0_11, %c0_12] : memref<3x64x384xf32, #tpu.memory_space<vmem>>, vector<1x64x384xf32>
    %10 = vector.shape_cast %9 : vector<1x64x384xf32> to vector<64x384xf32>
    %cst_13 = arith.constant dense<0.000000e+00> : vector<8x384xf32>
    %11 = tpu.matmul %8, %10, %cst_13 {dimension_numbers = #tpu.dot_dimension_numbers<[1], [0], [0], [1], [0, 0, 1, 1], [], []>} : vector<8x64xf32>, vector<64x384xf32>, vector<8x384xf32> -> vector<8x384xf32>
    %12 = arith.addf %7, %11 : vector<8x384xf32>
    %13 = vector.extract_strided_slice %6 {offsets = [1, 0], sizes = [8, 64], strides = [1, 1]} : vector<10x64xf32> to vector<8x64xf32>
    %c1 = arith.constant 1 : index
    %c0_14 = arith.constant 0 : index
    %c0_15 = arith.constant 0 : index
    %14 = vector.load %arg5[%c1, %c0_14, %c0_15] : memref<3x64x384xf32, #tpu.memory_space<vmem>>, vector<1x64x384xf32>
    %15 = vector.shape_cast %14 : vector<1x64x384xf32> to vector<64x384xf32>
    %cst_16 = arith.constant dense<0.000000e+00> : vector<8x384xf32>
    %16 = tpu.matmul %13, %15, %cst_16 {dimension_numbers = #tpu.dot_dimension_numbers<[1], [0], [0], [1], [0, 0, 1, 1], [], []>} : vector<8x64xf32>, vector<64x384xf32>, vector<8x384xf32> -> vector<8x384xf32>
    %17 = arith.addf %12, %16 : vector<8x384xf32>
    %18 = vector.extract_strided_slice %6 {offsets = [2, 0], sizes = [8, 64], strides = [1, 1]} : vector<10x64xf32> to vector<8x64xf32>
    %c2 = arith.constant 2 : index
    %c0_17 = arith.constant 0 : index
    %c0_18 = arith.constant 0 : index
    %19 = vector.load %arg5[%c2, %c0_17, %c0_18] : memref<3x64x384xf32, #tpu.memory_space<vmem>>, vector<1x64x384xf32>
    %20 = vector.shape_cast %19 : vector<1x64x384xf32> to vector<64x384xf32>
    %cst_19 = arith.constant dense<0.000000e+00> : vector<8x384xf32>
    %21 = tpu.matmul %18, %20, %cst_19 {dimension_numbers = #tpu.dot_dimension_numbers<[1], [0], [0], [1], [0, 0, 1, 1], [], []>} : vector<8x64xf32>, vector<64x384xf32>, vector<8x384xf32> -> vector<8x384xf32>
    %22 = arith.addf %17, %21 : vector<8x384xf32>
    %c0_20 = arith.constant 0 : index
    %c0_21 = arith.constant 0 : index
    %c0_22 = arith.constant 0 : index
    %23 = vector.load %arg6[%c0_20, %c0_21, %c0_22] : memref<1x8x384xf32, #tpu.memory_space<vmem>>, vector<1x8x384xf32>
    %24 = vector.shape_cast %23 : vector<1x8x384xf32> to vector<8x384xf32>
    %25 = vector.shape_cast %22 : vector<8x384xf32> to vector<1x8x384xf32>
    tpu.vector_store %arg6[%c0_20, %c0_21, %c0_22], %25 {strides = array<i32>} : memref<1x8x384xf32, #tpu.memory_space<vmem>>, vector<1x8x384xf32>,
    %cst_23 = arith.constant dense<0.000000e+00> : vector<384xf32>
    %26 = vector.multi_reduction <add>, %22, %cst_23 [0] : vector<8x384xf32> to vector<384xf32>
    %27 = vector.shape_cast %26 : vector<384xf32> to vector<1x384xf32>
    %28 = arith.mulf %22, %22 : vector<8x384xf32>
    %cst_24 = arith.constant dense<0.000000e+00> : vector<384xf32>
    %29 = vector.multi_reduction <add>, %28, %cst_24 [0] : vector<8x384xf32> to vector<384xf32>
    %30 = vector.shape_cast %29 : vector<384xf32> to vector<1x384xf32>
    %31 = tpu.concatenate %27, %30 in 0 : vector<1x384xf32>, vector<1x384xf32> -> vector<2x384xf32>
    %c0_i32 = arith.constant 0 : i32
    %32 = arith.cmpi eq, %arg1, %c0_i32 : i32
    %33 = arith.extui %32 : i1 to i32
    %c0_i32_25 = arith.constant 0 : i32
    %34 = arith.cmpi ne, %33, %c0_i32_25 : i32
    scf.if %34 {
      %cst_32 = arith.constant 0.000000e+00 : f32
      %41 = vector.broadcast %cst_32 : f32 to vector<1x2x384xf32>
      %c0_33 = arith.constant 0 : index
      %c0_34 = arith.constant 0 : index
      %c0_35 = arith.constant 0 : index
      %42 = vector.load %arg7[%c0_33, %c0_34, %c0_35] : memref<1x2x384xf32, #tpu.memory_space<vmem>>, vector<1x2x384xf32>
      tpu.vector_store %arg7[%c0_33, %c0_34, %c0_35], %41 {strides = array<i32>} : memref<1x2x384xf32, #tpu.memory_space<vmem>>, vector<1x2x384xf32>,
    } else {
    }
    %c0_26 = arith.constant 0 : index
    %c0_27 = arith.constant 0 : index
    %c0_28 = arith.constant 0 : index
    %35 = vector.load %arg7[%c0_26, %c0_27, %c0_28] : memref<1x2x384xf32, #tpu.memory_space<vmem>>, vector<1x2x384xf32>
    %36 = vector.shape_cast %35 : vector<1x2x384xf32> to vector<2x384xf32>
    %37 = arith.addf %36, %31 : vector<2x384xf32>
    %c0_29 = arith.constant 0 : index
    %c0_30 = arith.constant 0 : index
    %c0_31 = arith.constant 0 : index
    %38 = vector.load %arg7[%c0_29, %c0_30, %c0_31] : memref<1x2x384xf32, #tpu.memory_space<vmem>>, vector<1x2x384xf32>
    %39 = vector.shape_cast %38 : vector<1x2x384xf32> to vector<2x384xf32>
    %40 = vector.shape_cast %37 : vector<2x384xf32> to vector<1x2x384xf32>
    tpu.vector_store %arg7[%c0_29, %c0_30, %c0_31], %40 {strides = array<i32>} : memref<1x2x384xf32, #tpu.memory_space<vmem>>, vector<1x2x384xf32>,
    return
  }
  func.func @transform_0(%arg0: i32, %arg1: i32) -> (i32, i32, i32, i32) {
    %c0_i32 = arith.constant 0 : i32
    %c0_i32_0 = arith.constant 0 : i32
    %c0_i32_1 = arith.constant 0 : i32
    return %arg0, %arg1, %c0_i32, %c0_i32_0 : i32, i32, i32, i32
  }
  func.func @transform_1(%arg0: i32, %arg1: i32) -> (i32, i32, i32) {
    %c0_i32 = arith.constant 0 : i32
    %c0_i32_0 = arith.constant 0 : i32
    return %arg0, %arg1, %c0_i32 : i32, i32, i32
  }
  func.func @transform_2(%arg0: i32, %arg1: i32) -> (i32, i32, i32, i32) {
    %c0_i32 = arith.constant 0 : i32
    %c0_i32_0 = arith.constant 0 : i32
    %c0_i32_1 = arith.constant 0 : i32
    return %arg0, %arg1, %c0_i32, %c0_i32_0 : i32, i32, i32, i32
  }
  func.func @transform_3(%arg0: i32, %arg1: i32) -> (i32, i32, i32) {
    %c0_i32 = arith.constant 0 : i32
    %c0_i32_0 = arith.constant 0 : i32
    %c0_i32_1 = arith.constant 0 : i32
    %c0_i32_2 = arith.constant 0 : i32
    return %c0_i32, %c0_i32_0, %c0_i32_1 : i32, i32, i32
  }
  func.func @transform_4(%arg0: i32, %arg1: i32) -> (i32, i32, i32) {
    %c0_i32 = arith.constant 0 : i32
    %c0_i32_0 = arith.constant 0 : i32
    return %arg0, %arg1, %c0_i32 : i32, i32, i32
  }
  func.func @transform_5(%arg0: i32, %arg1: i32) -> (i32, i32, i32) {
    %c0_i32 = arith.constant 0 : i32
    %c0_i32_0 = arith.constant 0 : i32
    %c0_i32_1 = arith.constant 0 : i32
    return %arg0, %c0_i32, %c0_i32_0 : i32, i32, i32
  }
}

module attributes {stable_mosaic.version = 11 : i64} {
  func.func @_bn_sum_kernel(%arg0: i32, %arg1: i32, %arg2: memref<1x8x384xf32, #tpu.memory_space<vmem>>, %arg3: memref<1x384xf32, #tpu.memory_space<vmem>>, %arg4: memref<1x128xf32, #tpu.memory_space<vmem>>, %arg5: memref<1x8x128xf32, #tpu.memory_space<vmem>>) attributes {dimension_semantics = [#tpu.dimension_semantics<parallel>, #tpu.dimension_semantics<parallel>], iteration_bounds = array<i64: 2, 2>, scalar_prefetch = 0 : i64, scratch_operands = 0 : i64, tpu.core_type = #tpu.core_type<tc>, window_params = [{transform_indices = @transform_0, window_bounds = array<i64: 1, 8, 384>}, {pipeline_mode = #tpu.pipeline_mode<synchronous>, transform_indices = @transform_1, window_bounds = array<i64: 1, 384>}, {pipeline_mode = #tpu.pipeline_mode<synchronous>, transform_indices = @transform_2, window_bounds = array<i64: 1, 128>}, {transform_indices = @transform_3, window_bounds = array<i64: 1, 8, 128>}]} {
    %c0 = arith.constant 0 : index
    %c0_0 = arith.constant 0 : index
    %c0_1 = arith.constant 0 : index
    %0 = vector.load %arg2[%c0, %c0_0, %c0_1] : memref<1x8x384xf32, #tpu.memory_space<vmem>>, vector<1x8x384xf32>
    %1 = vector.shape_cast %0 : vector<1x8x384xf32> to vector<8x384xf32>
    %c0_2 = arith.constant 0 : index
    %c0_3 = arith.constant 0 : index
    %2 = vector.load %arg3[%c0_2, %c0_3] : memref<1x384xf32, #tpu.memory_space<vmem>>, vector<1x384xf32>
    %3 = vector.broadcast %2 : vector<1x384xf32> to vector<8x384xf32>
    %4 = arith.mulf %1, %3 : vector<8x384xf32>
    %5 = vector.extract_strided_slice %4 {offsets = [0, 0], sizes = [8, 128], strides = [1, 1]} : vector<8x384xf32> to vector<8x128xf32>
    %6 = vector.extract_strided_slice %4 {offsets = [0, 128], sizes = [8, 128], strides = [1, 1]} : vector<8x384xf32> to vector<8x128xf32>
    %7 = arith.addf %5, %6 : vector<8x128xf32>
    %8 = vector.extract_strided_slice %4 {offsets = [0, 256], sizes = [8, 128], strides = [1, 1]} : vector<8x384xf32> to vector<8x128xf32>
    %9 = arith.addf %7, %8 : vector<8x128xf32>
    %c0_4 = arith.constant 0 : index
    %c0_5 = arith.constant 0 : index
    %10 = vector.load %arg4[%c0_4, %c0_5] : memref<1x128xf32, #tpu.memory_space<vmem>>, vector<1x128xf32>
    %11 = vector.broadcast %10 : vector<1x128xf32> to vector<8x128xf32>
    %12 = arith.addf %9, %11 : vector<8x128xf32>
    %c0_6 = arith.constant 0 : index
    %c0_7 = arith.constant 0 : index
    %c0_8 = arith.constant 0 : index
    %13 = vector.load %arg5[%c0_6, %c0_7, %c0_8] : memref<1x8x128xf32, #tpu.memory_space<vmem>>, vector<1x8x128xf32>
    %14 = vector.shape_cast %13 : vector<1x8x128xf32> to vector<8x128xf32>
    %15 = vector.shape_cast %12 : vector<8x128xf32> to vector<1x8x128xf32>
    tpu.vector_store %arg5[%c0_6, %c0_7, %c0_8], %15 {strides = array<i32>} : memref<1x8x128xf32, #tpu.memory_space<vmem>>, vector<1x8x128xf32>,
    return
  }
  func.func @transform_0(%arg0: i32, %arg1: i32) -> (i32, i32, i32) {
    %c0_i32 = arith.constant 0 : i32
    %c0_i32_0 = arith.constant 0 : i32
    return %arg0, %arg1, %c0_i32 : i32, i32, i32
  }
  func.func @transform_1(%arg0: i32, %arg1: i32) -> (i32, i32) {
    %c0_i32 = arith.constant 0 : i32
    %c0_i32_0 = arith.constant 0 : i32
    %c0_i32_1 = arith.constant 0 : i32
    return %c0_i32, %c0_i32_0 : i32, i32
  }
  func.func @transform_2(%arg0: i32, %arg1: i32) -> (i32, i32) {
    %c0_i32 = arith.constant 0 : i32
    %c0_i32_0 = arith.constant 0 : i32
    %c0_i32_1 = arith.constant 0 : i32
    return %c0_i32, %c0_i32_0 : i32, i32
  }
  func.func @transform_3(%arg0: i32, %arg1: i32) -> (i32, i32, i32) {
    %c0_i32 = arith.constant 0 : i32
    %c0_i32_0 = arith.constant 0 : i32
    return %arg0, %arg1, %c0_i32 : i32, i32, i32
  }
}

</mosaic_0001>

<bundles_post_ra>
// kernel: acblock_forward.3
= control target key start
LH: loop header
LB: loop body
LE: loop exit
PB: predicated region body
PF: predicated region fallthrough
CT: control target
= control target key end

     0   :  { %s441_s12 = smov 0   ;;  %s443_s13 = smov 0   ;;  %s498_s0 = inlined_call_operand.vmem [shape: f32[2,16,384], index: 0, kind: input, shape index: {}]   ;;  %s499_s1 = inlined_call_operand.vmem [shape: f32[1,384], index: 1, kind: input, shape index: {}]   ;;  %s500_s2 = inlined_call_operand.vmem [shape: f32[1,128], index: 2, kind: input, shape index: {}]   ;;  %s501_s3 = inlined_call_operand.vmem [shape: f32[2,16,128], index: 3, kind: output, shape index: {}]  }
   0x1   :  { %s445_s14 = smov 0   ;;  %s447_s15 = smov 0  }
   0x2   :  { %s449_s16 = smov 0  }
   0x3 LB: > { %s22_s17 = sadd.s32 1, %s411_s14  ;;  %s25_s18 = sadd.s32 1, %s415_s15  ;;  %s419_s16 = sphi %s449_s16, %s13_s16   ;;  %s415_s15 = sphi %s447_s15, %s505_s15   ;;  %s411_s14 = sphi %s445_s14, %s504_s14   ;;  %s407_s13 = sphi %s443_s13, %s503_s13   ;;  %s403_s12 = sphi %s441_s12, %s502_s12  }
   0x4   : > { %p23_p0 = scmp.ge.s32.totalorder %s22_s17, 2  ;;  %p332_p1 = scmp.ge.s32.totalorder %s419_s16, 1 }
   0x5   : > { %p157_p2 = scmp.lt.s32.totalorder %s419_s16, 5 }
   0x6   : > { %s507_s17 = smov (%p23_p0, %s22_s17), 0  ;;  %s509_s18 = smov (!%p23_p0, %s25_s18), %s415_s15 }
   0x7   : > { %p158_p3 = pnand %p332_p1, %p157_p2  ;;  %p27_p4 = scmp.ge.s32.totalorder %s509_s18, 2 }
   0x8   : > { %p188_p5 = scmp.lt.s32.totalorder (!%p158_p3), %s407_s13, 1  ;;  %p190_p6 = scmp.lt.s32.totalorder (!%p158_p3), %s403_s12, 1  ;;  %v210_v0 = vlaneseq (!%p158_p3)  ;;  %v208_v2 = vld [vmem:[%s499_s1] sm:$0x7] (!%p158_p3) }
   0x9   : > { %s511_s18 = smov (%p27_p4, %s509_s18), 0  ;;  %161 = sbr.rel (%p158_p3) target bundleno = 33 (0x21), region = 32 }
   0xa   : > { %v211_v1 = vshrl.u32 (!%p158_p3), %v210_v0, 7  ;;  %v336_v16 = vld [vmem:[%s500_s2] ss:$0 sm:$0xff] (!%p158_p3) }
   0xc   : > { %v212_v3 = vsub.s32 (!%p158_p3), 0, %v211_v1  ;;  %v216_v4 = vsub.s32 (!%p158_p3), 1, %v211_v1  ;;  %v220_v5 = vsub.s32 (!%p158_p3), 2, %v211_v1 }
   0xe   : > { %v213_v6 = vrot.slane (!%p158_p3), %v208_v2, %v212_v3  ;;  %v217_v7 = vrot.slane (!%p158_p3), %v208_v2, %v216_v4  ;;  %v221_v8 = vrot.slane (!%p158_p3), %v208_v2, %v220_v5 }
  0x10   : > { %s513_s13 = smov (!%p188_p5, %s407_s13), 1  ;;  %s515_s12 = smov (!%p190_p6, %s403_s12), 1 }
  0x11   : > { %s340_s19 = smul.u32 6, %s513_s13  ;;  %s334_s24 = sshll.u32 %s513_s13, 1 }
  0x12   : > { %s339_s22 = smul.u32 3, %s515_s12  ;;  %s202_s29 = sadd.s32 %s334_s24, %s515_s12 }
  0x13   : > { %s335_s30 = sshll.u32 %s202_s29, 3 }
  0x14   : > { %s194_s23 = sadd.s32 %s340_s19, %s339_s22  ;;  %s204_s8 = scalar_lea.vmem %s501_s3, %s335_s30 }
  0x15   : > { %s333_s25 = sshll.u32 %s194_s23, 3 }
  0x16   : > { %s196_s28 = scalar_lea.vmem %s498_s0, %s333_s25 }
  0x17   : > { %v205_v9 = vld [vmem:[%s196_s28] sm:$0xff]  ;;  %v206_v10 = vld [vmem:[%s196_s28 + $0x8] sm:$0xff]  ;;  %v207_v11 = vld [vmem:[%s196_s28 + $0x10] sm:$0xff] }
  0x18   : > { %v225_v12 = vmul.f32 %v213_v6, %v205_v9  ;;  %v226_v13 = vmul.f32 %v217_v7, %v206_v10  ;;  %v227_v14 = vmul.f32 %v221_v8, %v207_v11 }
  0x1a   : > { %v228_v15 = vadd.f32 %v226_v13, %v225_v12 }
  0x1c   : > { %v229_v17 = vadd.f32 %v228_v15, %v227_v14 }
  0x1e   : > { %v237_v18 = vadd.f32 %v336_v16, %v229_v17 }
  0x20   : > { %238 = vst [vmem:[%s204_s8] sm:$0xff] %v237_v18 }
  0x21 PF: > { %s13_s16 = sadd.s32 1, %s419_s16   ;;  %s502_s12 = smov %s411_s14 }
  0x22   : > { %p10_p7 = scmp.ge.s32.totalorder %s13_s16, 6   ;;  %s503_s13 = smov %s415_s15 }
  0x23   : > { %s504_s14 = smov %s507_s17  ;;  %s505_s15 = smov %s511_s18 }
  0x24   :  { %12 = sbr.rel (!%p10_p7) target bundleno = 3 (0x3), region = 62 }

// kernel: acblock_forward.2
= control target key start
LH: loop header
LB: loop body
LE: loop exit
PB: predicated region body
PF: predicated region fallthrough
CT: control target
= control target key end

     0   :  { %s1454_s18 = smov 0   ;;  %s1456_s19 = smov 0   ;;  %s1799_s0 = inlined_call_operand.vmem [shape: f32[2,2,1,64], index: 0, kind: input, shape index: {}]   ;;  %s1800_s1 = inlined_call_operand.vmem [shape: f32[2,16,64], index: 1, kind: input, shape index: {}]   ;;  %s1801_s2 = inlined_call_operand.vmem [shape: f32[2,2,1,64], index: 2, kind: input, shape index: {}]   ;;  %s1802_s3 = inlined_call_operand.vmem [shape: f32[3,64,384], index: 3, kind: input, shape index: {}]   ;;  %s1803_s4 = inlined_call_operand.vmem [shape: f32[2,16,384], index: 4, kind: output, shape index: {0}]   ;;  %s1804_s5 = inlined_call_operand.vmem [shape: f32[2,2,384], index: 5, kind: output, shape index: {1}]  }
   0x1   :  { %s1458_s20 = smov 0   ;;  %s1460_s21 = smov 0  }
   0x2   :  { %s1462_s22 = smov 0  }
   0x3 LB: > { %s25_s23 = sadd.s32 1, %s1409_s20  ;;  %s28_s24 = sadd.s32 1, %s1413_s21  ;;  %s1417_s22 = sphi %s1462_s22, %s16_s22   ;;  %s1413_s21 = sphi %s1460_s21, %s1808_s21   ;;  %s1409_s20 = sphi %s1458_s20, %s1807_s20   ;;  %s1405_s19 = sphi %s1456_s19, %s1806_s19   ;;  %s1401_s18 = sphi %s1454_s18, %s1805_s18  }
   0x4   : > { %p26_p0 = scmp.ge.s32.totalorder %s25_s23, 2  ;;  %p1091_p1 = scmp.ge.s32.totalorder %s1417_s22, 1 }
   0x5   : > { %p237_p2 = scmp.lt.s32.totalorder %s1417_s22, 5 }
   0x6   : > { %s1810_s23 = smov (%p26_p0, %s25_s23), 0  ;;  %s1812_s24 = smov (!%p26_p0, %s28_s24), %s1413_s21 }
   0x7   : > { %p238_p3 = pnand %p1091_p1, %p237_p2  ;;  %p30_p4 = scmp.ge.s32.totalorder %s1812_s24, 2 }
   0x8   : > { %v1100_v0 = vld [vmem:[%s1802_s3 + $0xc8] sm:$0xff] (!%p238_p3)  ;;  %v1103_v1 = vld [vmem:[%s1802_s3 + $0xe0] sm:$0xff] (!%p238_p3)  ;;  %v1101_v2 = vld [vmem:[%s1802_s3 + $0xd0] sm:$0xff] (!%p238_p3)  ;;  %v1419_v3 = vmov (!%p238_p3), 0.0|0.0   ;;  %vm1420_vm0 = vmmov (!%p238_p3), 0   ;;  %v1421_v8 = vmov (!%p238_p3), 0.0  }
   0x9   : > { %s1814_s24 = smov (%p30_p4, %s1812_s24), 0  ;;  %241 = sbr.rel (%p238_p3) target bundleno = 303 (0x12f), region = 36 }
   0xa   : > { %1256 = vmatprep.subr.bf16.mxu1 (!%p238_p3), %v1419_v3  ;;  %v1240_v4 = vpack.c.bf16 (!%p238_p3), %v1103_v1, %v1100_v0  ;;  %v1104_v5 = vld [vmem:[%s1802_s3 + $0xe8] sm:$0xff] (!%p238_p3)  ;;  %v1099_v6 = vld [vmem:[%s1802_s3 + $0xc0] sm:$0xff] (!%p238_p3)  ;;  %v1102_v7 = vld [vmem:[%s1802_s3 + $0xd8] sm:$0xff] (!%p238_p3)  ;;  %1199 = vmatprep.mubr.msk.f32.mxu1 (!%p238_p3), %vm1420_vm0, %v1421_v8  ;;  %p291_p5 = scmp.lt.s32.totalorder (!%p238_p3), %s1405_s19, 1  ;;  %p293_p6 = scmp.lt.s32.totalorder (!%p238_p3), %s1401_s18, 1  ;;  %vm339_vm1 = vcmask (!%p238_p3), 1040384  }
   0xb   : > { %v1257_v9 = vpack.c.bf16 (!%p238_p3), %v1104_v5, %v1101_v2  ;;  %v1242_v10 = vpack.c.bf16 (!%p238_p3), %v1102_v7, %v1099_v6  ;;  %v1106_v11 = vld [vmem:[%s1802_s3 + $0xf8] sm:$0xff] (!%p238_p3)  ;;  %v1109_v12 = vld [vmem:[%s1802_s3 + $0x110] sm:$0xff] (!%p238_p3)  ;;  %v1107_v13 = vld [vmem:[%s1802_s3 + $0x100] sm:$0xff] (!%p238_p3)  ;;  %464 = vmatprep.mubr.f32.mxu0 (!%p238_p3), %v1421_v8  ;;  %vm393_vm2 = vcmask (!%p238_p3), 1046528   ;;  %vm397_vm3 = vcmask (!%p238_p3), 523264   ;;  %p1153_p7 = scmp.ne.s32.totalorder (!%p238_p3), %s1401_s18, 0 }
   0xc   : > { %1241 = vmatprep.subr.bf16.mxu0 (!%p238_p3), %v1240_v4  ;;  %v1244_v14 = vpack.c.bf16 (!%p238_p3), %v1109_v12, %v1106_v11  ;;  %v1110_v15 = vld [vmem:[%s1802_s3 + $0x118] sm:$0xff] (!%p238_p3)  ;;  %v1105_v16 = vld [vmem:[%s1802_s3 + $0xf0] sm:$0xff] (!%p238_p3)  ;;  %v1108_v17 = vld [vmem:[%s1802_s3 + $0x108] sm:$0xff] (!%p238_p3)  ;;  %vm709_vm4 = vcmask (!%p238_p3), 1045504  }
   0xd   : > { %1258 = vmatpush3.bf16.msra.mxu1 (!%p238_p3), %v1257_v9  ;;  %1243 = vmatpush1.bf16.msra.mxu0 (!%p238_p3), %v1242_v10  ;;  %v1260_v18 = vpack.c.bf16 (!%p238_p3), %v1110_v15, %v1107_v13  ;;  %v1246_v19 = vpack.c.bf16 (!%p238_p3), %v1108_v17, %v1105_v16  ;;  %v1112_v20 = vld [vmem:[%s1802_s3 + $0x128] sm:$0xff] (!%p238_p3)  ;;  %v1115_v21 = vld [vmem:[%s1802_s3 + $0x140] sm:$0xff] (!%p238_p3)  ;;  %v1113_v22 = vld [vmem:[%s1802_s3 + $0x130] sm:$0xff] (!%p238_p3) }
   0xe   : > { %1259 = vmatprep.subr.bf16.mxu1 (!%p238_p3), %v1419_v3  ;;  %1245 = vmatprep.subr.bf16.mxu0 (!%p238_p3), %v1244_v14  ;;  %v1248_v23 = vpack.c.bf16 (!%p238_p3), %v1115_v21, %v1112_v20  ;;  %v1116_v24 = vld [vmem:[%s1802_s3 + $0x148] sm:$0xff] (!%p238_p3)  ;;  %v1111_v25 = vld [vmem:[%s1802_s3 + $0x120] sm:$0xff] (!%p238_p3)  ;;  %v1114_v26 = vld [vmem:[%s1802_s3 + $0x138] sm:$0xff] (!%p238_p3) }
   0xf   : > { %v1118_v27 = vld [vmem:[%s1802_s3 + $0x158] sm:$0xff] (!%p238_p3)  ;;  %v1121_v28 = vld [vmem:[%s1802_s3 + $0x170] sm:$0xff] (!%p238_p3)  ;;  %v1119_v29 = vld [vmem:[%s1802_s3 + $0x160] sm:$0xff] (!%p238_p3)  ;;  %v1263_v30 = vpack.c.bf16 (!%p238_p3), %v1116_v24, %v1113_v22  ;;  %v1250_v31 = vpack.c.bf16 (!%p238_p3), %v1114_v26, %v1111_v25 }
  0x10   : > { %s1816_s19 = smov (!%p291_p5, %s1405_s19), 1  ;;  %v1122_v32 = vld [vmem:[%s1802_s3 + $0x178] sm:$0xff]  ;;  %v1117_v33 = vld [vmem:[%s1802_s3 + $0x150] sm:$0xff]  ;;  %v1120_v34 = vld [vmem:[%s1802_s3 + $0x168] sm:$0xff]  ;;  %v1252_v35 = vpack.c.bf16 %v1121_v28, %v1118_v27 }
  0x11   : > { %s1545_s12 = scalar_select %p293_p6, %s1401_s18, 1  ;;  %1261 = vmatpush3.bf16.msra.mxu1 %v1260_v18  ;;  %1247 = vmatpush1.bf16.msra.mxu0 %v1246_v19  ;;  %v343_v40 = vld [vmem:[%s1802_s3 + $0x8] sm:$0xff]  ;;  %v346_v41 = vld [vmem:[%s1802_s3 + $0x20] sm:$0xff]  ;;  %v1266_v42 = vpack.c.bf16 %v1122_v32, %v1119_v29  ;;  %v1254_v43 = vpack.c.bf16 %v1120_v34, %v1117_v33  ;;  %v344_v46 = vld [vmem:[%s1802_s3 + $0x10] sm:$0xff] }
  0x12   : > { %s1092_s26 = sshll.u32 %s1816_s19, 1  ;;  %s1333_s27 = smul.u32 6, %s1816_s19  ;;  %1262 = vmatprep.subr.bf16.mxu1 %v1419_v3  ;;  %1249 = vmatprep.subr.bf16.mxu0 %v1248_v23  ;;  %v1268_v49 = vpack.c.bf16 %v346_v41, %v343_v40  ;;  %v347_v50 = vld [vmem:[%s1802_s3 + $0x28] sm:$0xff]  ;;  %v342_v51 = vld [vmem:[%s1802_s3] sm:$0xff]  ;;  %v345_v52 = vld [vmem:[%s1802_s3 + $0x18] sm:$0xff] }
  0x13   : > { %s296_s7 = sadd.s32 %s1092_s26, %s1545_s12  ;;  %s1332_s8 = smul.u32 3, %s1545_s12  ;;  %v349_v53 = vld [vmem:[%s1802_s3 + $0x38] sm:$0xff]  ;;  %v352_v54 = vld [vmem:[%s1802_s3 + $0x50] sm:$0xff]  ;;  %v1285_v56 = vpack.c.bf16 %v347_v50, %v344_v46  ;;  %v1270_v57 = vpack.c.bf16 %v345_v52, %v342_v51  ;;  %v350_v58 = vld [vmem:[%s1802_s3 + $0x40] sm:$0xff] }
  0x14   : > { %s297_s14 = scalar_lea.vmem %s1799_s0, %s296_s7  ;;  %s1094_s15 = sshll.u32 %s296_s7, 3  ;;  %v1272_v59 = vpack.c.bf16 %v352_v54, %v349_v53  ;;  %v353_v60 = vld [vmem:[%s1802_s3 + $0x58] sm:$0xff]  ;;  %v348_v61 = vld [vmem:[%s1802_s3 + $0x30] sm:$0xff]  ;;  %v351_v62 = vld [vmem:[%s1802_s3 + $0x48] sm:$0xff] }
  0x15   : > { %s305_s30 = scalar_lea.vmem %s1800_s1, %s1094_s15  ;;  %s312_s10 = scalar_lea.vmem %s1801_s2, %s296_s7  ;;  %v327_v36 = vld [vmem:[%s297_s14] sm:$0x1]  ;;  %1264 = vmatpush3.bf16.msra.mxu1 %v1263_v30  ;;  %1251 = vmatpush1.bf16.msra.mxu0 %v1250_v31  ;;  %v355_v63 = vld [vmem:[%s1802_s3 + $0x68] sm:$0xff]  ;;  %v1288_v1 = vpack.c.bf16 %v353_v60, %v350_v58  ;;  %v1274_v2 = vpack.c.bf16 %v351_v62, %v348_v61  ;;  %v356_v4 = vld [vmem:[%s1802_s3 + $0x70] sm:$0xff] }
  0x16   : > { %v328_v37 = vld [vmem:[%s305_s30] sm:$0xff]  ;;  %s1589_s11 = sadd.s32 %s1333_s27, %s1332_s8  ;;  %s1594_s16 = scalar_lea.vmem %s1804_s5, %s1333_s27  ;;  %1265 = vmatprep.subr.bf16.mxu1 %v1419_v3  ;;  %1253 = vmatprep.subr.bf16.mxu0 %v1252_v35  ;;  %v359_v6 = vld [vmem:[%s1802_s3 + $0x88] sm:$0xff]  ;;  %v357_v9 = vld [vmem:[%s1802_s3 + $0x78] sm:$0xff] }
  0x17   : > { %v1098_v38 = vld [vmem:[%s312_s10] ss:$0 sm:$0xff]  ;;  %v331_v39 = vrot.slane %v328_v37, 7  ;;  %v361_v10 = vld [vmem:[%s1802_s3 + $0x98] sm:$0xff]  ;;  %v364_v11 = vld [vmem:[%s1802_s3 + $0xb0] sm:$0xff]  ;;  %v1291_v12 = vpack.c.bf16 %v359_v6, %v356_v4  ;;  %s1096_s30 = sshll.u32 %s1589_s11, 3 }
  0x18   : > { %v358_v0 = vld [vmem:[%s1802_s3 + $0x80] sm:$0xff]  ;;  %v1280_v15 = vpack.c.bf16 %v364_v11, %v361_v10  ;;  %v365_v16 = vld [vmem:[%s1802_s3 + $0xb8] sm:$0xff]  ;;  %v360_v17 = vld [vmem:[%s1802_s3 + $0x90] sm:$0xff]  ;;  %s321_s10 = scalar_lea.vmem %s1803_s4, %s1096_s30 }
  0x19   : > { %v1603_v44 = vsel %vm339_vm1, %v327_v36, %v331_v39  ;;  %v1606_v45 = vsel %vm339_vm1, %v331_v39, %v1098_v38  ;;  %1267 = vmatpush3.bf16.msra.mxu1 %v1266_v42  ;;  %1255 = vmatpush1.bf16.msra.mxu0 %v1254_v43  ;;  %v1276_v5 = vpack.c.bf16 %v358_v0, %v355_v63  ;;  %v354_v7 = vld [vmem:[%s1802_s3 + $0x60] sm:$0xff]  ;;  %v363_v18 = vld [vmem:[%s1802_s3 + $0xa8] sm:$0xff]  ;;  %v1129_v23 = vld [vmem:[%s1802_s3 + $0x190] sm:$0xff] }
  0x1a   : > { %v394_v47 = vrot.slane %v1603_v44, 1  ;;  %v395_v48 = vrot.slane %v1606_v45, 1  ;;  %1284 = vmatprep.subr.bf16.mxu1 %v1419_v3  ;;  %1269 = vmatprep.subr.bf16.mxu0 %v1268_v49  ;;  %v1278_v13 = vpack.c.bf16 %v357_v9, %v354_v7  ;;  %v362_v14 = vld [vmem:[%s1802_s3 + $0xa0] sm:$0xff]  ;;  %v1128_v19 = vld [vmem:[%s1802_s3 + $0x188] sm:$0xff]  ;;  %v1282_v22 = vpack.c.bf16 %v363_v18, %v360_v17  ;;  %v1130_v27 = vld [vmem:[%s1802_s3 + $0x198] sm:$0xff] }
  0x1b   : > { %v1131_v20 = vld [vmem:[%s1802_s3 + $0x1a0] sm:$0xff]  ;;  %v1294_v21 = vpack.c.bf16 %v365_v16, %v362_v14  ;;  %v1132_v25 = vld [vmem:[%s1802_s3 + $0x1a8] sm:$0xff]  ;;  %v1134_v28 = vld [vmem:[%s1802_s3 + $0x1b8] sm:$0xff] }
  0x1c   : > { %v396_v55 = vsel %vm393_vm2, %v394_v47, %v395_v48  ;;  %v1296_v24 = vpack.c.bf16 %v1131_v20, %v1128_v19  ;;  %v1127_v26 = vld [vmem:[%s1802_s3 + $0x180] sm:$0xff]  ;;  %v1137_v29 = vld [vmem:[%s1802_s3 + $0x1d0] sm:$0xff]  ;;  %v1313_v30 = vpack.c.bf16 %v1132_v25, %v1129_v23  ;;  %v1138_v34 = vld [vmem:[%s1802_s3 + $0x1d8] sm:$0xff] }
  0x1d   : > { %1200 = vmatmul.mubr.msk.f32.vlgmr.msra.gmra.mrb[0].mxu1 %vm397_vm3, %v396_v55  ;;  %1123 = vmatmul.mubr.msk.f32.vlgmr.msra.gmra.mrb[0].mxu0 %vm397_vm3, %v396_v55  ;;  %v1298_v31 = vpack.c.bf16 %v1130_v27, %v1127_v26  ;;  %v1135_v32 = vld [vmem:[%s1802_s3 + $0x1c0] sm:$0xff]  ;;  %v1300_v33 = vpack.c.bf16 %v1137_v29, %v1134_v28  ;;  %v1133_v35 = vld [vmem:[%s1802_s3 + $0x1b0] sm:$0xff]  ;;  %v1136_v36 = vld [vmem:[%s1802_s3 + $0x1c8] sm:$0xff] }
  0x1e   : > { %1286 = vmatpush3.bf16.msra.mxu1 %v1285_v56  ;;  %1271 = vmatpush1.bf16.msra.mxu0 %v1270_v57  ;;  %v1140_v37 = vld [vmem:[%s1802_s3 + $0x1e8] sm:$0xff]  ;;  %v1143_v38 = vld [vmem:[%s1802_s3 + $0x200] sm:$0xff]  ;;  %v1316_v39 = vpack.c.bf16 %v1138_v34, %v1135_v32  ;;  %v1302_v40 = vpack.c.bf16 %v1136_v36, %v1133_v35  ;;  %v1141_v41 = vld [vmem:[%s1802_s3 + $0x1f0] sm:$0xff]  ;;  %v711_v56 = vrot.slane %v1606_v45, 2 }
  0x1f   : > { %1287 = vmatprep.subr.bf16.mxu1 %v1419_v3  ;;  %1273 = vmatprep.subr.bf16.mxu0 %v1272_v59  ;;  %v1304_v42 = vpack.c.bf16 %v1143_v38, %v1140_v37  ;;  %v1144_v43 = vld [vmem:[%s1802_s3 + $0x208] sm:$0xff]  ;;  %v1139_v46 = vld [vmem:[%s1802_s3 + $0x1e0] sm:$0xff]  ;;  %v1142_v47 = vld [vmem:[%s1802_s3 + $0x1f8] sm:$0xff]  ;;  %v710_v59 = vrot.slane %v1603_v44, 2 }
  0x20   : > { %1218 = vmatprep.mubr.msk.f32.mxu1 %vm1420_vm0, %v1421_v8  ;;  %607 = vmatprep.mubr.f32.mxu0 %v1421_v8  ;;  %v1146_v48 = vld [vmem:[%s1802_s3 + $0x218] sm:$0xff]  ;;  %v1149_v49 = vld [vmem:[%s1802_s3 + $0x230] sm:$0xff]  ;;  %v1319_v50 = vpack.c.bf16 %v1144_v43, %v1141_v41  ;;  %v1306_v51 = vpack.c.bf16 %v1142_v47, %v1139_v46  ;;  %v1147_v52 = vld [vmem:[%s1802_s3 + $0x220] sm:$0xff] }
  0x21   : > { %v1308_v53 = vpack.c.bf16 %v1149_v49, %v1146_v48  ;;  %v1150_v54 = vld [vmem:[%s1802_s3 + $0x238] sm:$0xff]  ;;  %v1148_v55 = vld [vmem:[%s1802_s3 + $0x228] sm:$0xff]  ;;  %v712_v60 = vsel %vm709_vm4, %v710_v59, %v711_v56 }
  0x22   : > { %1289 = vmatpush3.bf16.msra.mxu1 %v1288_v1  ;;  %1275 = vmatpush1.bf16.msra.mxu0 %v1274_v2  ;;  %v1322_v57 = vpack.c.bf16 %v1150_v54, %v1147_v52 }
  0x23   : > { %1290 = vmatprep.subr.bf16.mxu1 %v1419_v3  ;;  %1277 = vmatprep.subr.bf16.mxu0 %v1276_v5 }
  0x26   : > { %1292 = vmatpush3.bf16.msra.mxu1 %v1291_v12  ;;  %1279 = vmatpush1.bf16.msra.mxu0 %v1278_v13 }
  0x27   : > { %1293 = vmatprep.subr.bf16.mxu1 %v1419_v3  ;;  %1281 = vmatprep.subr.bf16.mxu0 %v1280_v15 }
  0x2a   : > { %1295 = vmatpush3.bf16.msra.mxu1 %v1294_v21  ;;  %1283 = vmatpush1.bf16.msra.mxu0 %v1282_v22 }
  0x2b   : > { %1312 = vmatprep.subr.bf16.mxu1 %v1419_v3  ;;  %1297 = vmatprep.subr.bf16.mxu0 %v1296_v24 }
  0x2d   : > { %1219 = vmatmul.mubr.msk.f32.vlgmr.msra.gmra.mrb[0].mxu1 %vm397_vm3, %v1603_v44  ;;  %1125 = vmatmul.mubr.msk.f32.vlgmr.msra.gmra.mrb[0].mxu0 %vm397_vm3, %v1603_v44 }
  0x2e   : > { %1314 = vmatpush3.bf16.msra.mxu1 %v1313_v30  ;;  %1299 = vmatpush1.bf16.msra.mxu0 %v1298_v31 }
  0x2f   : > { %1315 = vmatprep.subr.bf16.mxu1 %v1419_v3  ;;  %1301 = vmatprep.subr.bf16.mxu0 %v1300_v33 }
  0x30   : > { %1237 = vmatprep.mubr.msk.f32.mxu1 %vm1420_vm0, %v1421_v8  ;;  %779 = vmatprep.mubr.f32.mxu0 %v1421_v8  ;;  %v1145_v8 = vld [vmem:[%s1802_s3 + $0x210] sm:$0xff] }
  0x31   : > { %v1310_v58 = vpack.c.bf16 %v1148_v55, %v1145_v8 }
  0x32   : > { %1317 = vmatpush3.bf16.msra.mxu1 %v1316_v39  ;;  %1303 = vmatpush1.bf16.msra.mxu0 %v1302_v40 }
  0x33   : > { %1318 = vmatprep.subr.bf16.mxu1 %v1419_v3  ;;  %1305 = vmatprep.subr.bf16.mxu0 %v1304_v42  ;;  %v1422_v42 = vmov (!%p1153_p7), 0.0  }
  0x34   : > { %908 = vst [vmem:[%s1594_s16] sm:$0x3f] (!%p1153_p7), %v1422_v42 }
  0x36   : > { %1320 = vmatpush3.bf16.msra.mxu1 %v1319_v50  ;;  %1307 = vmatpush1.bf16.msra.mxu0 %v1306_v51 }
  0x37   : > { %1321 = vmatprep.subr.bf16.mxu1 %v1419_v3  ;;  %1309 = vmatprep.subr.bf16.mxu0 %v1308_v53 }
  0x3a   : > { %1323 = vmatpush3.bf16.msra.mxu1 %v1322_v57  ;;  %1311 = vmatpush1.bf16.msra.mxu0 %v1310_v58 }
  0x3d   : > { %1238 = vmatmul.mubr.msk.f32.vlgmr.msra.gmra.mrb[0].mxu1 %vm397_vm3, %v712_v60  ;;  %1151 = vmatmul.mubr.msk.f32.vlgmr.msra.gmra.mrb[0].mxu0 %vm397_vm3, %v712_v60 }
 0x110   : > { %v852_v45 = vpop.f32.mrb[0].mxu1  ;;  %v781_v61 = vpop.f32.mrb[0].mxu0 }
 0x111   : > { %861 = vst [vmem:[%s321_s10 + $0x10] sm:$0xff] %v852_v45  ;;  %v874_v44 = vrot.slane %v852_v45, 4  ;;  %v882_v62 = vmul.f32 %v852_v45, %v852_v45  ;;  %859 = vst [vmem:[%s321_s10] sm:$0xff] %v781_v61  ;;  %v862_v3 = vrot.slane %v781_v61, 4  ;;  %v880_v63 = vmul.f32 %v781_v61, %v781_v61  ;;  %v1239_v0 = vpop.f32.mrb[1].mxu1  ;;  %v783_v1 = vpop.f32.mrb[1].mxu0 }
 0x112   : > { %860 = vst [vmem:[%s321_s10 + $0x8] sm:$0xff] %v783_v1  ;;  %v868_v2 = vrot.slane %v783_v1, 4  ;;  %v881_v4 = vmul.f32 %v783_v1, %v783_v1 }
 0x113   : > { %v875_v5 = vadd.f32 %v874_v44, %v852_v45  ;;  %v895_v6 = vrot.slane %v882_v62, 4  ;;  %v863_v7 = vadd.f32 %v862_v3, %v781_v61  ;;  %v883_v9 = vrot.slane %v880_v63, 4 }
 0x114   : > { %v869_v10 = vadd.f32 %v868_v2, %v783_v1  ;;  %v889_v11 = vrot.slane %v881_v4, 4 }
 0x115   : > { %v876_v12 = vrot.slane %v875_v5, 2  ;;  %v896_v13 = vadd.f32 %v895_v6, %v882_v62  ;;  %v864_v14 = vrot.slane %v863_v7, 2  ;;  %v884_v15 = vadd.f32 %v883_v9, %v880_v63 }
 0x116   : > { %v870_v16 = vrot.slane %v869_v10, 2  ;;  %v890_v17 = vadd.f32 %v889_v11, %v881_v4 }
 0x117   : > { %v877_v18 = vadd.f32 %v876_v12, %v875_v5  ;;  %v897_v19 = vrot.slane %v896_v13, 2  ;;  %v865_v20 = vadd.f32 %v864_v14, %v863_v7  ;;  %v885_v21 = vrot.slane %v884_v15, 2 }
 0x118   : > { %v871_v22 = vadd.f32 %v870_v16, %v869_v10  ;;  %v891_v23 = vrot.slane %v890_v17, 2 }
 0x119   : > { %v878_v24 = vrot.slane %v877_v18, 1  ;;  %v898_v25 = vadd.f32 %v897_v19, %v896_v13  ;;  %v866_v26 = vrot.slane %v865_v20, 1  ;;  %v886_v27 = vadd.f32 %v885_v21, %v884_v15 }
 0x11a   : > { %v872_v28 = vrot.slane %v871_v22, 1  ;;  %v892_v29 = vadd.f32 %v891_v23, %v890_v17  ;;  %907 = sbr.rel (%p1153_p7) target bundleno = 289 (0x121), region = 40 }
 0x11b   : > { %v899_v30 = vrot.slane %v898_v25, 1  ;;  %v887_v31 = vrot.slane %v886_v27, 1  ;;  %v879_v33 = vadd.f32 %v878_v24, %v877_v18  ;;  %v867_v35 = vadd.f32 %v866_v26, %v865_v20 }
 0x11c   : > { %v893_v32 = vrot.slane %v892_v29, 1  ;;  %v873_v37 = vadd.f32 %v872_v28, %v871_v22 }
 0x11d   : > { %v900_v34 = vadd.f32 %v899_v30, %v898_v25  ;;  %v888_v36 = vadd.f32 %v887_v31, %v886_v27 }
 0x11e   : > { %v894_v38 = vadd.f32 %v893_v32, %v892_v29 }
 0x11f   : > { %v903_v39 = vsel %vm339_vm1, %v879_v33, %v900_v34  ;;  %v901_v40 = vsel %vm339_vm1, %v867_v35, %v888_v36 }
 0x120   : > { %v902_v41 = vsel %vm339_vm1, %v873_v37, %v894_v38 }
 0x121 PF: > { %v917_v43 = vlaneseq  ;;  %v1423_v46 = vmov 1983009808   ;;  %v913_v49 = vcombine.low %v901_v40, %v902_v41  ;;  %v909_v54 = vld [vmem:[%s1594_s16] sm:$0x3f] }
 0x122   : > { %v915_v47 = vunpack.c.l.s4 %v1423_v46 }
 0x123   : > { %v918_v48 = vshrl.u32 %v917_v43, 7 }
 0x124   : > { %v916_v50 = vunpack.c.0.s8 %v915_v47 }
 0x126   : > { %v919_v51 = vsub.s32 %v916_v50, %v918_v48 }
 0x128   : > { %v920_v52 = vrot.slane %v913_v49, %v919_v51  ;;  %v927_v53 = vrot.slane %v903_v39, %v919_v51 }
 0x12a   : > { %v928_v8 = vcombine.low %v920_v52, %v927_v53 }
 0x12c   : > { %v930_v55 = vadd.f32 %v928_v8, %v909_v54 }
 0x12e   : > { %931 = vst [vmem:[%s1594_s16] sm:$0x3f] %v930_v55 }
 0x12f PF: > { %s16_s22 = sadd.s32 1, %s1417_s22   ;;  %s1805_s18 = smov %s1409_s20 }
 0x130   : > { %p13_p8 = scmp.ge.s32.totalorder %s16_s22, 6   ;;  %s1806_s19 = smov %s1413_s21 }
 0x131   : > { %s1807_s20 = smov %s1810_s23  ;;  %s1808_s21 = smov %s1814_s24 }
 0x132   :  { %15 = sbr.rel (!%p13_p8) target bundleno = 3 (0x3), region = 90 }

</bundles_post_ra>
